<compile_context>
chip_gen: v5e
topology: v5e:2x2
jax: 0.10.0
libtpu: 0.0.40
codegen_flags: <defaults>
</compile_context>

<pallas_src>
import jax
import jax.numpy as jnp
from jax import lax
from jax.experimental import pallas as pl
from jax.experimental.pallas import tpu as pltpu

EMBEDDING_DIM = 64
HIDDEN_DIM = 4 * EMBEDDING_DIM  # 256
DROPOUT_P = 0.1                 # unused in eval-mode forward

ROW_CHUNK = 256                 # in-kernel sub-chunk (rows) for the hidden intermediate
MAX_TM = 2048                   # max rows per grid step (VMEM-safe on v5e/v6e/v7x)


def _choose_tm(n_rows):
    """Pick the row-tile size.

    Small problems: one tile covering everything (rounded up to a sublane
    multiple of 8). Large problems: big tiles (multiple of ROW_CHUNK so the
    in-kernel chunk loop divides evenly), capped at MAX_TM, aiming for >= ~8
    grid steps so the pipeline has depth and v7x megacore can shard the
    parallel axis.
    """
    rounded8 = ((n_rows + 7) // 8) * 8
    if rounded8 <= ROW_CHUNK:
        return rounded8
    target = pl.cdiv(n_rows, 8)                      # ~8 grid steps
    tm = max(ROW_CHUNK, min(MAX_TM, target))
    tm = ((tm + ROW_CHUNK - 1) // ROW_CHUNK) * ROW_CHUNK
    return min(tm, MAX_TM)


def ffn_kernel(x_ref, w1_ref, b1_ref, w2_ref, b2_ref, o_ref):
    """One row-tile of the feed-forward network.

    x_ref:  (tm, D)   input rows (native dtype, fed straight to the MXU)
    w1_ref: (D, 4D)   first linear weight (in, out)  -- resident across grid
    b1_ref: (1, 4D)   first linear bias
    w2_ref: (4D, D)   second linear weight (in, out) -- resident across grid
    b2_ref: (1, D)    second linear bias
    o_ref:  (tm, D)   output rows
    """
    w1 = w1_ref[...]
    w2 = w2_ref[...]
    # Hoist bias broadcasts out of the chunk loop.
    b1 = b1_ref[...].astype(jnp.float32)
    b2 = b2_ref[...].astype(jnp.float32)

    tm = o_ref.shape[0]
    chunk = min(tm, ROW_CHUNK)
    n_chunks = tm // chunk  # tm is a multiple of chunk by construction

    def compute(row_start):
        # Feed native dtype to the MXU; accumulate in f32.
        x = x_ref[pl.ds(row_start, chunk), :]
        h = jnp.dot(x, w1, preferred_element_type=jnp.float32) + b1
        h = jnp.maximum(h, 0.0)                      # ReLU in f32 (v5e-friendly)
        y = jnp.dot(h.astype(w2.dtype), w2, preferred_element_type=jnp.float32) + b2
        # Dropout: identity (eval mode).
        o_ref[pl.ds(row_start, chunk), :] = y.astype(o_ref.dtype)

    if n_chunks == 1:
        compute(0)
    else:
        def body(c, carry):
            compute(pl.multiple_of(c * chunk, chunk))
            return carry
        lax.fori_loop(0, n_chunks, body, 0, unroll=n_chunks <= 8)


def feed_forward(x, w1, b1, w2, b2, *, tm=None):
    """x: (B, T, D). Returns (B, T, D) in x.dtype. Weights are (in, out)."""
    B, T, D = x.shape
    assert D == EMBEDDING_DIM
    N = B * T
    x2 = x.reshape(N, D)

    if tm is None:
        tm = _choose_tm(N)
    else:
        assert tm % 8 == 0 and (tm <= ROW_CHUNK or tm % ROW_CHUNK == 0)
    grid = pl.cdiv(N, tm)

    b1_2d = b1.reshape(1, HIDDEN_DIM)
    b2_2d = b2.reshape(1, D)

    out = pl.pallas_call(
        ffn_kernel,
        out_shape=jax.ShapeDtypeStruct((N, D), x.dtype),
        grid_spec=pltpu.PrefetchScalarGridSpec(
            num_scalar_prefetch=0,
            grid=(grid,),
            in_specs=[
                pl.BlockSpec((tm, D), lambda i: (i, 0)),            # x rows (streamed)
                pl.BlockSpec((D, HIDDEN_DIM), lambda i: (0, 0)),    # w1 (resident)
                pl.BlockSpec((1, HIDDEN_DIM), lambda i: (0, 0)),    # b1
                pl.BlockSpec((HIDDEN_DIM, D), lambda i: (0, 0)),    # w2 (resident)
                pl.BlockSpec((1, D), lambda i: (0, 0)),             # b2
            ],
            out_specs=pl.BlockSpec((tm, D), lambda i: (i, 0)),
        ),
        compiler_params=pltpu.CompilerParams(
            dimension_semantics=("parallel",),
            # Tiles + resident weights stay well under this on v5e/v6e and under
            # v7x's 64 MiB physical VMEM.
            vmem_limit_bytes=48 * 1024 * 1024,
        ),
    )(x2, w1, b1_2d, w2, b2_2d)

    return out.reshape(B, T, D)


def init_params(key, embedding_dim=EMBEDDING_DIM):
    """Deterministic init mimicking nn.Linear default (uniform +-1/sqrt(fan_in)).

    Weights are stored as (in_features, out_features)."""
    hidden = 4 * embedding_dim
    k1, k2, k3, k4 = jax.random.split(key, 4)
    bound1 = 1.0 / jnp.sqrt(embedding_dim)
    bound2 = 1.0 / jnp.sqrt(hidden)
    w1 = jax.random.uniform(k1, (embedding_dim, hidden), jnp.float32, -bound1, bound1)
    b1 = jax.random.uniform(k2, (hidden,), jnp.float32, -bound1, bound1)
    w2 = jax.random.uniform(k3, (hidden, embedding_dim), jnp.float32, -bound2, bound2)
    b2 = jax.random.uniform(k4, (embedding_dim,), jnp.float32, -bound2, bound2)
    return w1, b1, w2, b2


def reference(x, w1, b1, w2, b2):
    xf = x.astype(jnp.float32)
    h = jnp.maximum(xf @ w1.astype(jnp.float32) + b1, 0.0)
    return h @ w2.astype(jnp.float32) + b2


if __name__ == "__main__":
    key = jax.random.PRNGKey(0)
    kx, kp, kx2 = jax.random.split(key, 3)
    w1, b1, w2, b2 = init_params(kp)

    # --- small shape matching the module (f32, single tile) ---
    B, T, D = 2, 8, EMBEDDING_DIM
    x = jax.random.normal(kx, (B, T, D), jnp.float32)
    y = jax.block_until_ready(feed_forward(x, w1, b1, w2, b2))
    y_ref = reference(x, w1, b1, w2, b2)
    assert y.shape == (B, T, D)
    assert jnp.allclose(y, y_ref, atol=1e-4, rtol=1e-4), "f32 small mismatch vs reference"

    # --- larger shape: exercises multi-step grid, in-kernel chunk loop, and the
    #     masked partial final block (no host-side pad/slice). ---
    B2, T2 = 7, 600  # N = 4200 rows -> tm = 768, grid = 6 (last block partial)
    xl = jax.random.normal(kx2, (B2, T2, D), jnp.float32)
    yl = jax.block_until_ready(feed_forward(xl, w1, b1, w2, b2))
    yl_ref = reference(xl, w1, b1, w2, b2)
    assert yl.shape == (B2, T2, D)
    assert jnp.allclose(yl, yl_ref, atol=1e-4, rtol=1e-4), "f32 large mismatch vs reference"

    # --- bf16 I/O path (half the HBM bytes; f32 accumulation on the MXU) ---
    xb = xl.astype(jnp.bfloat16)
    w1b, w2b = w1.astype(jnp.bfloat16), w2.astype(jnp.bfloat16)
    yb = jax.block_until_ready(feed_forward(xb, w1b, b1, w2b, b2))
    yb_ref = reference(xb, w1b, b1, w2b, b2)
    assert yb.dtype == jnp.bfloat16
    assert jnp.allclose(yb.astype(jnp.float32), yb_ref, atol=1e-1, rtol=1e-1), \
        "bf16 mismatch vs reference"

    print("KERNEL_OK")
</pallas_src>

<mosaic_0001>
module attributes {stable_mosaic.version = 11 : i64} {
  func.func @ffn_kernel(%arg0: i32, %arg1: memref<16x64xf32, #tpu.memory_space<vmem>>, %arg2: memref<64x256xf32, #tpu.memory_space<vmem>>, %arg3: memref<1x256xf32, #tpu.memory_space<vmem>>, %arg4: memref<256x64xf32, #tpu.memory_space<vmem>>, %arg5: memref<1x64xf32, #tpu.memory_space<vmem>>, %arg6: memref<16x64xf32, #tpu.memory_space<vmem>>) attributes {dimension_semantics = [#tpu.dimension_semantics<parallel>], iteration_bounds = array<i64: 1>, scalar_prefetch = 0 : i64, scratch_operands = 0 : i64, tpu.core_type = #tpu.core_type<tc>, window_params = [{transform_indices = @transform_0, window_bounds = array<i64: 16, 64>}, {pipeline_mode = #tpu.pipeline_mode<synchronous>, transform_indices = @transform_1, window_bounds = array<i64: 64, 256>}, {pipeline_mode = #tpu.pipeline_mode<synchronous>, transform_indices = @transform_2, window_bounds = array<i64: 1, 256>}, {pipeline_mode = #tpu.pipeline_mode<synchronous>, transform_indices = @transform_3, window_bounds = array<i64: 256, 64>}, {pipeline_mode = #tpu.pipeline_mode<synchronous>, transform_indices = @transform_4, window_bounds = array<i64: 1, 64>}, {transform_indices = @transform_5, window_bounds = array<i64: 16, 64>}]} {
    %c0 = arith.constant 0 : index
    %c0_0 = arith.constant 0 : index
    %0 = vector.load %arg2[%c0, %c0_0] : memref<64x256xf32, #tpu.memory_space<vmem>>, vector<64x256xf32>
    %c0_1 = arith.constant 0 : index
    %c0_2 = arith.constant 0 : index
    %1 = vector.load %arg4[%c0_1, %c0_2] : memref<256x64xf32, #tpu.memory_space<vmem>>, vector<256x64xf32>
    %c0_3 = arith.constant 0 : index
    %c0_4 = arith.constant 0 : index
    %2 = vector.load %arg3[%c0_3, %c0_4] : memref<1x256xf32, #tpu.memory_space<vmem>>, vector<1x256xf32>
    %c0_5 = arith.constant 0 : index
    %c0_6 = arith.constant 0 : index
    %3 = vector.load %arg5[%c0_5, %c0_6] : memref<1x64xf32, #tpu.memory_space<vmem>>, vector<1x64xf32>
    %c0_7 = arith.constant 0 : index
    %c0_8 = arith.constant 0 : index
    %4 = vector.load %arg1[%c0_7, %c0_8] : memref<16x64xf32, #tpu.memory_space<vmem>>, vector<16x64xf32>
    %cst = arith.constant dense<0.000000e+00> : vector<16x256xf32>
    %5 = tpu.matmul %4, %0, %cst {dimension_numbers = #tpu.dot_dimension_numbers<[1], [0], [0], [1], [0, 0, 1, 1], [], []>} : vector<16x64xf32>, vector<64x256xf32>, vector<16x256xf32> -> vector<16x256xf32>
    %6 = vector.broadcast %2 : vector<1x256xf32> to vector<16x256xf32>
    %7 = arith.addf %5, %6 : vector<16x256xf32>
    %cst_9 = arith.constant 0.000000e+00 : f32
    %8 = vector.broadcast %cst_9 : f32 to vector<16x256xf32>
    %9 = arith.maximumf %7, %8 : vector<16x256xf32>
    %cst_10 = arith.constant dense<0.000000e+00> : vector<16x64xf32>
    %10 = tpu.matmul %9, %1, %cst_10 {dimension_numbers = #tpu.dot_dimension_numbers<[1], [0], [0], [1], [0, 0, 1, 1], [], []>} : vector<16x256xf32>, vector<256x64xf32>, vector<16x64xf32> -> vector<16x64xf32>
    %11 = vector.broadcast %3 : vector<1x64xf32> to vector<16x64xf32>
    %12 = arith.addf %10, %11 : vector<16x64xf32>
    %c0_11 = arith.constant 0 : index
    %c0_12 = arith.constant 0 : index
    %13 = vector.load %arg6[%c0_11, %c0_12] : memref<16x64xf32, #tpu.memory_space<vmem>>, vector<16x64xf32>
    tpu.vector_store %arg6[%c0_11, %c0_12], %12 {strides = array<i32>} : memref<16x64xf32, #tpu.memory_space<vmem>>, vector<16x64xf32>,
    return
  }
  func.func @transform_0(%arg0: i32) -> (i32, i32) {
    %c0_i32 = arith.constant 0 : i32
    %c0_i32_0 = arith.constant 0 : i32
    return %arg0, %c0_i32 : i32, i32
  }
  func.func @transform_1(%arg0: i32) -> (i32, i32) {
    %c0_i32 = arith.constant 0 : i32
    %c0_i32_0 = arith.constant 0 : i32
    %c0_i32_1 = arith.constant 0 : i32
    return %c0_i32, %c0_i32_0 : i32, i32
  }
  func.func @transform_2(%arg0: i32) -> (i32, i32) {
    %c0_i32 = arith.constant 0 : i32
    %c0_i32_0 = arith.constant 0 : i32
    %c0_i32_1 = arith.constant 0 : i32
    return %c0_i32, %c0_i32_0 : i32, i32
  }
  func.func @transform_3(%arg0: i32) -> (i32, i32) {
    %c0_i32 = arith.constant 0 : i32
    %c0_i32_0 = arith.constant 0 : i32
    %c0_i32_1 = arith.constant 0 : i32
    return %c0_i32, %c0_i32_0 : i32, i32
  }
  func.func @transform_4(%arg0: i32) -> (i32, i32) {
    %c0_i32 = arith.constant 0 : i32
    %c0_i32_0 = arith.constant 0 : i32
    %c0_i32_1 = arith.constant 0 : i32
    return %c0_i32, %c0_i32_0 : i32, i32
  }
  func.func @transform_5(%arg0: i32) -> (i32, i32) {
    %c0_i32 = arith.constant 0 : i32
    %c0_i32_0 = arith.constant 0 : i32
    return %arg0, %c0_i32 : i32, i32
  }
}

</mosaic_0001>

<bundles_post_ra>
// kernel: tpu_custom_call.1
= control target key start
LH: loop header
LB: loop body
LE: loop exit
PB: predicated region body
PF: predicated region fallthrough
CT: control target
= control target key end

     0   :  { %vm78_vm0 = vcmask 523264   ;;  %s436_s0 = inlined_call_operand.vmem [shape: f32[16,64], index: 0, kind: input, shape index: {}]   ;;  %s437_s1 = inlined_call_operand.vmem [shape: f32[64,256], index: 1, kind: input, shape index: {}]   ;;  %s438_s2 = inlined_call_operand.vmem [shape: f32[1,256], index: 2, kind: input, shape index: {}]   ;;  %s439_s3 = inlined_call_operand.vmem [shape: f32[256,64], index: 3, kind: input, shape index: {}]   ;;  %s440_s4 = inlined_call_operand.vmem [shape: f32[1,64], index: 4, kind: input, shape index: {}]   ;;  %s441_s5 = inlined_call_operand.hbm [shape: f32[16,64], index: 5, kind: output, shape index: {}]  }
   0x1   :  { %v35_v0 = vld [vmem:[%s437_s1 + $0x70] sm:$0xff]  ;;  %v33_v1 = vld [vmem:[%s437_s1 + $0x60] sm:$0xff]  ;;  %v36_v2 = vld [vmem:[%s437_s1 + $0x78] sm:$0xff] }
   0x2   :  { %93 = vmatpush.msra.mxu0 %v35_v0  ;;  %116 = vmatpush.msra.mxu1 %v36_v2  ;;  %v34_v3 = vld [vmem:[%s437_s1 + $0x68] sm:$0xff]  ;;  %v31_v4 = vld [vmem:[%s437_s1 + $0x50] sm:$0xff]  ;;  %v32_v5 = vld [vmem:[%s437_s1 + $0x58] sm:$0xff] }
   0x3   :  { %v29_v6 = vld [vmem:[%s437_s1 + $0x40] sm:$0xff]  ;;  %v30_v7 = vld [vmem:[%s437_s1 + $0x48] sm:$0xff]  ;;  %v27_v8 = vld [vmem:[%s437_s1 + $0x30] sm:$0xff] }
   0x4   :  { %94 = vmatpush.msra.mxu0 %v33_v1  ;;  %117 = vmatpush.msra.mxu1 %v34_v3  ;;  %v28_v9 = vld [vmem:[%s437_s1 + $0x38] sm:$0xff]  ;;  %v51_v12 = vld [vmem:[%s439_s3 + $0x70] sm:$0xff]  ;;  %v25_v14 = vld [vmem:[%s437_s1 + $0x20] sm:$0xff] }
   0x5   :  { %v52_v10 = vld [vmem:[%s439_s3 + $0x78] sm:$0xff]  ;;  %v67_v13 = vld [vmem:[%s439_s3 + $0xf0] sm:$0xff]  ;;  %v26_v15 = vld [vmem:[%s437_s1 + $0x28] sm:$0xff] }
   0x6   :  { %95 = vmatpush.msra.mxu0 %v31_v4  ;;  %118 = vmatpush.msra.mxu1 %v32_v5  ;;  %v68_v11 = vld [vmem:[%s439_s3 + $0xf8] sm:$0xff]  ;;  %v50_v16 = vld [vmem:[%s439_s3 + $0x68] sm:$0xff]  ;;  %v23_v18 = vld [vmem:[%s437_s1 + $0x10] sm:$0xff] }
   0x7   :  { %138 = vmatpush.msra.mxu2 %v52_v10  ;;  %161 = vmatpush.msra.mxu3 %v68_v11  ;;  %v66_v17 = vld [vmem:[%s439_s3 + $0xe8] sm:$0xff]  ;;  %v24_v19 = vld [vmem:[%s437_s1 + $0x18] sm:$0xff]  ;;  %v49_v20 = vld [vmem:[%s439_s3 + $0x60] sm:$0xff] }
   0x8   :  { %96 = vmatpush.msra.mxu0 %v29_v6  ;;  %119 = vmatpush.msra.mxu1 %v30_v7  ;;  %v65_v21 = vld [vmem:[%s439_s3 + $0xe0] sm:$0xff]  ;;  %v22_v23 = vld [vmem:[%s437_s1 + $0x8] sm:$0xff]  ;;  %v48_v25 = vld [vmem:[%s439_s3 + $0x58] sm:$0xff] }
   0x9   :  { %139 = vmatpush.msra.mxu2 %v51_v12  ;;  %162 = vmatpush.msra.mxu3 %v67_v13  ;;  %v21_v22 = vld [vmem:[%s437_s1] sm:$0xff]  ;;  %v64_v26 = vld [vmem:[%s439_s3 + $0xd8] sm:$0xff] }
   0xa   :  { %97 = vmatpush.msra.mxu0 %v27_v8  ;;  %120 = vmatpush.msra.mxu1 %v28_v9  ;;  %v71_v24 = vld [vmem:[%s436_s0] sm:$0xff] }
   0xb   :  { %140 = vmatpush.msra.mxu2 %v50_v16  ;;  %163 = vmatpush.msra.mxu3 %v66_v17 }
   0xc   :  { %98 = vmatpush.msra.mxu0 %v25_v14  ;;  %121 = vmatpush.msra.mxu1 %v26_v15 }
   0xd   :  { %141 = vmatpush.msra.mxu2 %v49_v20  ;;  %164 = vmatpush.msra.mxu3 %v65_v21 }
   0xe   :  { %99 = vmatpush.msra.mxu0 %v23_v18  ;;  %122 = vmatpush.msra.mxu1 %v24_v19 }
  0x10   :  { %100 = vmatpush.msra.mxu0 %v21_v22  ;;  %123 = vmatpush.msra.mxu1 %v22_v23 }
  0x11   :  { %10 = vsyncpa [#allocation3], 0  ;;  %204 = vmatmul.msk.f32.vlgmr.msra.gmra.mxu0 %vm78_vm0, %v71_v24  ;;  %206 = vmatmul.msk.f32.vlgmr.msra.gmra.mxu1 %vm78_vm0, %v71_v24  ;;  %v47_v27 = vld [vmem:[%s439_s3 + $0x50] sm:$0xff]  ;;  %v46_v29 = vld [vmem:[%s439_s3 + $0x48] sm:$0xff]  ;;  %s238_s16 = smov [#allocation2]   ;;  %s192_s20 = sshll.u32 %s441_s5, 4  ;;  %s193_s20 = int_to_ptr.hbm [resolvable:$true] %s192_s20 }
  0x12   :  { %v63_v28 = vld [vmem:[%s439_s3 + $0xd0] sm:$0xff]  ;;  %142 = vmatpush.msra.mxu2 %v48_v25  ;;  %165 = vmatpush.msra.mxu3 %v64_v26  ;;  %v62_v30 = vld [vmem:[%s439_s3 + $0xc8] sm:$0xff]  ;;  %v45_v31 = vld [vmem:[%s439_s3 + $0x40] sm:$0xff]  ;;  %s190_s17 = sshll.u32 %s238_s16, 4  ;;  %s240_s21 = smov 8   ;;  %s191_s17 = int_to_ptr.vmem [resolvable:$true] %s190_s17 }
  0x13   :  { %v61_v32 = vld [vmem:[%s439_s3 + $0xc0] sm:$0xff]  ;;  %v72_v33 = vld [vmem:[%s436_s0 + $0x8] sm:$0xff]  ;;  %v44_v34 = vld [vmem:[%s439_s3 + $0x38] sm:$0xff] }
  0x14   :  { %143 = vmatpush.msra.mxu2 %v47_v27  ;;  %166 = vmatpush.msra.mxu3 %v63_v28  ;;  %v60_v35 = vld [vmem:[%s439_s3 + $0xb8] sm:$0xff]  ;;  %v43_v36 = vld [vmem:[%s439_s3 + $0x30] sm:$0xff]  ;;  %v42_v38 = vld [vmem:[%s439_s3 + $0x28] sm:$0xff] }
  0x15   :  { %v59_v37 = vld [vmem:[%s439_s3 + $0xb0] sm:$0xff]  ;;  %v58_v39 = vld [vmem:[%s439_s3 + $0xa8] sm:$0xff]  ;;  %v41_v40 = vld [vmem:[%s439_s3 + $0x20] sm:$0xff] }
  0x16   :  { %144 = vmatpush.msra.mxu2 %v46_v29  ;;  %167 = vmatpush.msra.mxu3 %v62_v30  ;;  %v57_v41 = vld [vmem:[%s439_s3 + $0xa0] sm:$0xff]  ;;  %v40_v42 = vld [vmem:[%s439_s3 + $0x18] sm:$0xff]  ;;  %v39_v43 = vld [vmem:[%s439_s3 + $0x10] sm:$0xff] }
  0x17   :  { %v56_v44 = vld [vmem:[%s439_s3 + $0x98] sm:$0xff]  ;;  %v38_v45 = vld [vmem:[%s439_s3 + $0x8] sm:$0xff]  ;;  %v55_v46 = vld [vmem:[%s439_s3 + $0x90] sm:$0xff] }
  0x18   :  { %145 = vmatpush.msra.mxu2 %v45_v31  ;;  %168 = vmatpush.msra.mxu3 %v61_v32  ;;  %v37_v47 = vld [vmem:[%s439_s3] sm:$0xff]  ;;  %v54_v48 = vld [vmem:[%s439_s3 + $0x88] sm:$0xff] }
  0x19   :  { %205 = vmatmul.msk.f32.gmra.mxu0 %vm78_vm0, %v72_v33  ;;  %207 = vmatmul.msk.f32.gmra.mxu1 %vm78_vm0, %v72_v33  ;;  %v53_v49 = vld [vmem:[%s439_s3 + $0x80] sm:$0xff] }
  0x1a   :  { %146 = vmatpush.msra.mxu2 %v44_v34  ;;  %169 = vmatpush.msra.mxu3 %v60_v35  ;;  %v69_v50 = vld [vmem:[%s438_s2] sm:$0x3] }
  0x1b   :  { %v74_v51 = vperm.slane %v69_v50, 0  ;;  %v75_v52 = vperm.slane %v69_v50, 1  ;;  %v211_v1 = vld [vmem:[%s440_s4] ss:$0 sm:$0xff]  ;;  %s239_s4 = smov 128  }
  0x1c   :  { %147 = vmatpush.msra.mxu2 %v43_v36  ;;  %170 = vmatpush.msra.mxu3 %v59_v37 }
  0x1e   :  { %148 = vmatpush.msra.mxu2 %v42_v38  ;;  %171 = vmatpush.msra.mxu3 %v58_v39 }
  0x20   :  { %149 = vmatpush.msra.mxu2 %v41_v40  ;;  %172 = vmatpush.msra.mxu3 %v57_v41 }
  0x22   :  { %150 = vmatpush.msra.mxu2 %v40_v42  ;;  %173 = vmatpush.msra.mxu3 %v56_v44 }
  0x24   :  { %151 = vmatpush.msra.mxu2 %v39_v43  ;;  %174 = vmatpush.msra.mxu3 %v55_v46 }
  0x26   :  { %152 = vmatpush.msra.mxu2 %v38_v45  ;;  %175 = vmatpush.msra.mxu3 %v54_v48 }
  0x28   :  { %153 = vmatpush.msra.mxu2 %v37_v47  ;;  %176 = vmatpush.msra.mxu3 %v53_v49 }
  0x8e   :  { %v102_v53 = vpop.f32.mrf.mxu0  ;;  %v125_v54 = vpop.f32.mrf.mxu1 }
  0x8f   :  { %v103_v55 = vadd.f32 %v102_v53, %v74_v51  ;;  %v126_v56 = vadd.f32 %v125_v54, %v75_v52 }
  0x91   :  { %v131_v57 = vmax.f32 %v103_v55, 0.0  ;;  %v132_v58 = vmax.f32 %v126_v56, 0.0 }
  0x93   :  { %154 = vmatmul.f32.vlgmr.msra.gmra.mxu2 %v131_v57  ;;  %177 = vmatmul.f32.vlgmr.msra.gmra.mxu3 %v132_v58 }
  0x96   :  { %v105_v59 = vpop.f32.mrf.mxu0  ;;  %v128_v60 = vpop.f32.mrf.mxu1 }
  0x97   :  { %v106_v61 = vadd.f32 %v105_v59, %v74_v51  ;;  %v129_v62 = vadd.f32 %v128_v60, %v75_v52 }
  0x99   :  { %v133_v63 = vmax.f32 %v106_v61, 0.0  ;;  %v134_v0 = vmax.f32 %v129_v62, 0.0 }
  0x9b   :  { %157 = vmatmul.f32.gmra.mxu2 %v133_v63  ;;  %180 = vmatmul.f32.gmra.mxu3 %v134_v0 }
 0x116   :  { %v155_v2 = vpop.f32.mrf.mxu2  ;;  %v178_v3 = vpop.f32.mrf.mxu3 }
 0x117   :  { %v156_v4 = vadd.f32 %v211_v1, %v155_v2 }
 0x119   :  { %v179_v5 = vadd.f32 %v178_v3, %v156_v4 }
 0x11b   :  { %184 = vst.msk [vmem:[#allocation2] sm:$0xff] %vm78_vm0, %v179_v5 }
 0x11e   :  { %v158_v6 = vpop.f32.mrf.mxu2  ;;  %v181_v7 = vpop.f32.mrf.mxu3 }
 0x11f   :  { %v159_v8 = vadd.f32 %v211_v1, %v158_v6 }
 0x121   :  { %v182_v9 = vadd.f32 %v181_v7, %v159_v8 }
 0x123   :  { %185 = vst.msk [vmem:[#allocation2 + $0x8] sm:$0xff] %vm78_vm0, %v182_v9 }
 0x124   :  { %198 = dma.vmem_to_hbm [thread:$0]  %s191_s17, 256, %s193_s20, [#allocation3], %s239_s4, %s239_s4, %s240_s21  }
 0x125   :  { %236 = dma.done.wait [#allocation3], 256  }
 0x126   :  { %237 = vsyncadd [#allocation3], 4294967040 }
 0x127   :  { %203 = vsyncpa [#allocation3], 1 }

</bundles_post_ra>
